<compile_context>
chip_gen: v7x
topology: tpu7x:2x2x1
jax: 0.10.0
libtpu: 0.0.40
codegen_flags: <defaults>
</compile_context>

<pallas_src>
import jax
import jax.numpy as jnp
from jax.experimental import pallas as pl
from jax.experimental.pallas import tpu as pltpu


def _round_up(a, b):
    return ((a + b - 1) // b) * b


def _block_diag(w, fold):
    """(K, H) -> (fold*K, fold*H) block-diagonal replication of w."""
    if fold == 1:
        return w
    K, H = w.shape
    eye = jnp.eye(fold, dtype=w.dtype)
    return (eye[:, None, :, None] * w[None, :, None, :]).reshape(fold * K, fold * H)


def _team_offense_kernel(x_ref, w1_ref, b1_ref, w2_ref, b2_ref, o_ref):
    # relu(relu(x @ W1 + b1) @ W2 + b2), all in f32: the MXU has enormous slack at these
    # sizes, so f32 matmuls are free and match the f32 PyTorch module semantics.
    h = jnp.dot(x_ref[...], w1_ref[...], preferred_element_type=jnp.float32)
    h = jnp.maximum(h + b1_ref[...], 0.0)
    y = jnp.dot(h, w2_ref[...], preferred_element_type=jnp.float32)
    o_ref[...] = jnp.maximum(y + b2_ref[...], 0.0)


def team_offense_forward(x, w1, b1, w2, b2, *, tm_max=32768):
    """Fused TeamOffenseModule forward: relu(relu(x @ w1 + b1) @ w2 + b2).

    x:  (B, K) float32
    w1: (K, H1)   b1: (H1,) or (1, H1)      (weights stored as (in, out) = nn.Linear weight.T)
    w2: (H1, H2)  b2: (H2,) or (1, H2)
    Returns (B, H2) float32.
    """
    B, K = x.shape
    H1 = w1.shape[1]
    H2 = w2.shape[1]

    # Lane-dense batch folding factor (8 for K=16). Falls back to 1 for awkward K
    # (correct, just sub-128-lane stores).
    fold = 128 // K if (K < 128 and 128 % K == 0) else 1

    xf = jnp.asarray(x, jnp.float32)
    Bp = _round_up(B, fold)
    if Bp != B:
        # Tiny remainder pad only when B % fold != 0; padded rows are sliced off at the end.
        xf = jnp.pad(xf, ((0, Bp - B), (0, 0)))
    R = Bp // fold                       # folded batch rows
    xf = xf.reshape(R, fold * K)         # free row-major re-view (bitcast), stays f32

    w1f = _block_diag(jnp.asarray(w1, jnp.float32), fold)                 # (fold*K,  fold*H1)
    w2f = _block_diag(jnp.asarray(w2, jnp.float32), fold)                 # (fold*H1, fold*H2)
    b1f = jnp.tile(jnp.asarray(b1, jnp.float32).reshape(1, H1), (1, fold))  # (1, fold*H1)
    b2f = jnp.tile(jnp.asarray(b2, jnp.float32).reshape(1, H2), (1, fold))  # (1, fold*H2)

    # Batch-row tiling: large tiles amortize the per-grid-step overhead. tile_rows is a
    # multiple of 8 (or the full extent). The ragged last block (grid uses cdiv) is safe
    # because the computation is row-independent and OOB writes are dropped by Pallas.
    tile_rows_cap = max(8, _round_up(tm_max, 8 * fold) // fold)
    tile_rows = R if R <= tile_rows_cap else tile_rows_cap
    grid = (pl.cdiv(R, tile_rows),)

    out = pl.pallas_call(
        _team_offense_kernel,
        out_shape=jax.ShapeDtypeStruct((R, fold * H2), jnp.float32),
        grid=grid,
        in_specs=[
            # x streams one lane-dense, true-size batch tile per grid step.
            pl.BlockSpec((tile_rows, fold * K), lambda i: (i, 0)),
            # Weights / biases: constant index_map -> fetched once, VMEM-resident.
            pl.BlockSpec((fold * K, fold * H1), lambda i: (0, 0)),
            pl.BlockSpec((1, fold * H1), lambda i: (0, 0)),
            pl.BlockSpec((fold * H1, fold * H2), lambda i: (0, 0)),
            pl.BlockSpec((1, fold * H2), lambda i: (0, 0)),
        ],
        # Lane-dense output slab (fold*H2 = 256 lanes for H2=32): unmasked stores, no repack.
        out_specs=pl.BlockSpec((tile_rows, fold * H2), lambda i: (i, 0)),
        compiler_params=pltpu.CompilerParams(
            dimension_semantics=("parallel",),       # shard batch tiles across TCs on v7x
            vmem_limit_bytes=32 * 1024 * 1024,       # headroom over v5e's 16 MiB default scope
        ),
    )(xf, w1f, b1f, w2f, b2f)

    # Free re-view back to (Bp, H2), then drop the (at most fold-1) padded batch rows.
    return out.reshape(Bp, H2)[:B]


def _ref_forward(x, w1, b1, w2, b2):
    # Pure-JAX f32 reference with the same (in, out) weight layout.
    h = jnp.maximum(jnp.dot(x, w1) + b1.reshape(1, -1), 0.0)
    return jnp.maximum(jnp.dot(h, w2) + b2.reshape(1, -1), 0.0)


if __name__ == "__main__":
    key = jax.random.PRNGKey(0)
    k_x, k_w1, k_b1, k_w2, k_b2, k_big = jax.random.split(key, 6)

    batch = 8
    input_dim = 16
    hidden_dim = 32

    x = jax.random.normal(k_x, (batch, input_dim), dtype=jnp.float32)
    # PyTorch-style uniform fan-in init; weights stored as (in, out) = nn.Linear weight.T.
    bound1 = 1.0 / (input_dim ** 0.5)
    bound2 = 1.0 / (hidden_dim ** 0.5)
    w1 = jax.random.uniform(k_w1, (input_dim, hidden_dim),
                            minval=-bound1, maxval=bound1, dtype=jnp.float32)
    b1 = jax.random.uniform(k_b1, (hidden_dim,),
                            minval=-bound1, maxval=bound1, dtype=jnp.float32)
    w2 = jax.random.uniform(k_w2, (hidden_dim, hidden_dim),
                            minval=-bound2, maxval=bound2, dtype=jnp.float32)
    b2 = jax.random.uniform(k_b2, (hidden_dim,),
                            minval=-bound2, maxval=bound2, dtype=jnp.float32)

    # Small-shape run (module-consistent shapes).
    out = team_offense_forward(x, w1, b1, w2, b2)
    out = jax.block_until_ready(out)
    ref = _ref_forward(x, w1, b1, w2, b2)
    assert out.shape == (batch, hidden_dim)
    assert jnp.allclose(out, ref, atol=2e-2, rtol=2e-2), "small-batch mismatch vs reference"

    # Non-multiple batch with a small tile cap: exercises the fold-remainder pad,
    # a multi-step grid, and the ragged last block.
    big_b = 1003
    xb = jax.random.normal(k_big, (big_b, input_dim), dtype=jnp.float32)
    out_big = team_offense_forward(xb, w1, b1, w2, b2, tm_max=512)
    out_big = jax.block_until_ready(out_big)
    ref_big = _ref_forward(xb, w1, b1, w2, b2)
    assert out_big.shape == (big_b, hidden_dim)
    assert jnp.allclose(out_big, ref_big, atol=2e-2, rtol=2e-2), "tiled-batch mismatch vs reference"

    print("KERNEL_OK")
</pallas_src>

<mosaic_0001>
module attributes {stable_mosaic.version = 11 : i64} {
  func.func @_team_offense_kernel(%arg0: i32, %arg1: memref<1x128xf32, #tpu.memory_space<vmem>>, %arg2: memref<128x256xf32, #tpu.memory_space<vmem>>, %arg3: memref<1x256xf32, #tpu.memory_space<vmem>>, %arg4: memref<256x256xf32, #tpu.memory_space<vmem>>, %arg5: memref<1x256xf32, #tpu.memory_space<vmem>>, %arg6: memref<1x256xf32, #tpu.memory_space<vmem>>) attributes {dimension_semantics = [#tpu.dimension_semantics<parallel>], iteration_bounds = array<i64: 1>, scalar_prefetch = 0 : i64, scratch_operands = 0 : i64, tpu.core_type = #tpu.core_type<tc>, window_params = [{transform_indices = @transform_0, window_bounds = array<i64: 1, 128>}, {pipeline_mode = #tpu.pipeline_mode<synchronous>, transform_indices = @transform_1, window_bounds = array<i64: 128, 256>}, {pipeline_mode = #tpu.pipeline_mode<synchronous>, transform_indices = @transform_2, window_bounds = array<i64: 1, 256>}, {pipeline_mode = #tpu.pipeline_mode<synchronous>, transform_indices = @transform_3, window_bounds = array<i64: 256, 256>}, {pipeline_mode = #tpu.pipeline_mode<synchronous>, transform_indices = @transform_4, window_bounds = array<i64: 1, 256>}, {transform_indices = @transform_5, window_bounds = array<i64: 1, 256>}]} {
    %c0 = arith.constant 0 : index
    %c0_0 = arith.constant 0 : index
    %0 = vector.load %arg1[%c0, %c0_0] : memref<1x128xf32, #tpu.memory_space<vmem>>, vector<1x128xf32>
    %c0_1 = arith.constant 0 : index
    %c0_2 = arith.constant 0 : index
    %1 = vector.load %arg2[%c0_1, %c0_2] : memref<128x256xf32, #tpu.memory_space<vmem>>, vector<128x256xf32>
    %cst = arith.constant dense<0.000000e+00> : vector<1x256xf32>
    %2 = tpu.matmul %0, %1, %cst {dimension_numbers = #tpu.dot_dimension_numbers<[1], [0], [0], [1], [0, 0, 1, 1], [], []>} : vector<1x128xf32>, vector<128x256xf32>, vector<1x256xf32> -> vector<1x256xf32>
    %c0_3 = arith.constant 0 : index
    %c0_4 = arith.constant 0 : index
    %3 = vector.load %arg3[%c0_3, %c0_4] : memref<1x256xf32, #tpu.memory_space<vmem>>, vector<1x256xf32>
    %4 = arith.addf %2, %3 : vector<1x256xf32>
    %cst_5 = arith.constant 0.000000e+00 : f32
    %5 = vector.broadcast %cst_5 : f32 to vector<1x256xf32>
    %6 = arith.maximumf %4, %5 : vector<1x256xf32>
    %c0_6 = arith.constant 0 : index
    %c0_7 = arith.constant 0 : index
    %7 = vector.load %arg4[%c0_6, %c0_7] : memref<256x256xf32, #tpu.memory_space<vmem>>, vector<256x256xf32>
    %cst_8 = arith.constant dense<0.000000e+00> : vector<1x256xf32>
    %8 = tpu.matmul %6, %7, %cst_8 {dimension_numbers = #tpu.dot_dimension_numbers<[1], [0], [0], [1], [0, 0, 1, 1], [], []>} : vector<1x256xf32>, vector<256x256xf32>, vector<1x256xf32> -> vector<1x256xf32>
    %c0_9 = arith.constant 0 : index
    %c0_10 = arith.constant 0 : index
    %9 = vector.load %arg5[%c0_9, %c0_10] : memref<1x256xf32, #tpu.memory_space<vmem>>, vector<1x256xf32>
    %10 = arith.addf %8, %9 : vector<1x256xf32>
    %cst_11 = arith.constant 0.000000e+00 : f32
    %11 = vector.broadcast %cst_11 : f32 to vector<1x256xf32>
    %12 = arith.maximumf %10, %11 : vector<1x256xf32>
    %c0_12 = arith.constant 0 : index
    %c0_13 = arith.constant 0 : index
    %13 = vector.load %arg6[%c0_12, %c0_13] : memref<1x256xf32, #tpu.memory_space<vmem>>, vector<1x256xf32>
    tpu.vector_store %arg6[%c0_12, %c0_13], %12 {strides = array<i32>} : memref<1x256xf32, #tpu.memory_space<vmem>>, vector<1x256xf32>,
    return
  }
  func.func @transform_0(%arg0: i32) -> (i32, i32) {
    %c0_i32 = arith.constant 0 : i32
    %c0_i32_0 = arith.constant 0 : i32
    return %arg0, %c0_i32 : i32, i32
  }
  func.func @transform_1(%arg0: i32) -> (i32, i32) {
    %c0_i32 = arith.constant 0 : i32
    %c0_i32_0 = arith.constant 0 : i32
    %c0_i32_1 = arith.constant 0 : i32
    return %c0_i32, %c0_i32_0 : i32, i32
  }
  func.func @transform_2(%arg0: i32) -> (i32, i32) {
    %c0_i32 = arith.constant 0 : i32
    %c0_i32_0 = arith.constant 0 : i32
    %c0_i32_1 = arith.constant 0 : i32
    return %c0_i32, %c0_i32_0 : i32, i32
  }
  func.func @transform_3(%arg0: i32) -> (i32, i32) {
    %c0_i32 = arith.constant 0 : i32
    %c0_i32_0 = arith.constant 0 : i32
    %c0_i32_1 = arith.constant 0 : i32
    return %c0_i32, %c0_i32_0 : i32, i32
  }
  func.func @transform_4(%arg0: i32) -> (i32, i32) {
    %c0_i32 = arith.constant 0 : i32
    %c0_i32_0 = arith.constant 0 : i32
    %c0_i32_1 = arith.constant 0 : i32
    return %c0_i32, %c0_i32_0 : i32, i32
  }
  func.func @transform_5(%arg0: i32) -> (i32, i32) {
    %c0_i32 = arith.constant 0 : i32
    %c0_i32_0 = arith.constant 0 : i32
    return %arg0, %c0_i32 : i32, i32
  }
}

</mosaic_0001>

<bundles_post_ra>
// kernel: tpu_custom_call.1
= control target key start
LH: loop header
LB: loop body
LE: loop exit
PB: predicated region body
PF: predicated region fallthrough
CT: control target
= control target key end

     0   :  { %10 = vsyncpa [#allocation3], 0  ;;  %s662_s0 = inlined_call_operand.hbm [shape: f32[1,128], index: 0, kind: input, shape index: {}]   ;;  %s663_s1 = inlined_call_operand.hbm [shape: f32[128,256], index: 1, kind: input, shape index: {}]   ;;  %s664_s2 = inlined_call_operand.vmem [shape: f32[1,256], index: 2, kind: input, shape index: {}]   ;;  %s665_s3 = inlined_call_operand.hbm [shape: f32[256,256], index: 3, kind: input, shape index: {}]   ;;  %s666_s4 = inlined_call_operand.vmem [shape: f32[1,256], index: 4, kind: input, shape index: {}]   ;;  %s667_s5 = inlined_call_operand.hbm [shape: f32[1,256], index: 5, kind: output, shape index: {}]  }
   0x1   :  { %11 = vsyncpa [#allocation6], 0 }
   0x2   :  { %12 = vsyncpa [#allocation4], 0  ;;  %s564_s18 = smov [#allocation5]   ;;  %s470_s22 = scalar_lea.hbm %s663_s1, 4096 }
   0x3   :  { %s28_s19 = sshll.u32 %s564_s18, 4  ;;  %p471_p0 = scmp.ne.s32.totalorder %s663_s1, %s470_s22  ;;  %s29_s19 = int_to_ptr.vmem [resolvable:$true] %s28_s19 }
   0x4   :  { %p474_p1 = scmp.lt.u32.totalorder %s470_s22, %s663_s1 }
   0x6   :  { %p476_p2 = pnand %p474_p1, %p471_p0 }
   0x8   :  { %479 = shalt.err (!%p476_p2)
}
   0x9   :  { %s480_s27 = scalar_lea.vmem %s29_s19, 4096  ;;  %p485_p4 = scmp.lt.s32.totalorder %s29_s19, %s29_s19 }
   0xa   :  { %p481_p3 = scmp.ne.s32.totalorder %s29_s19, %s480_s27  ;;  %p486_p5 = scmp.lt.s32.totalorder %s480_s27, %s480_s27 }
   0xc   :  { %p487_p6 = por %p486_p5, %p485_p4 }
   0xe   :  { %p488_p7 = pnand %p487_p6, %p481_p3 }
  0x10   :  { %491 = shalt.err (!%p488_p7)
}
  0x11   :  { %s565_s28 = smov 256   ;;  %s566_s29 = smov 16  }
  0x12   :  { %34 = dma.hbm_to_vmem [thread:$0]  %s663_s1, 4096, %s29_s19, [#allocation6], %s565_s28, %s565_s28, %s566_s29  }
  0x13   :  { %s567_s7 = smov [#allocation2]   ;;  %s568_s9 = smov [#allocation7]  }
  0x14   :  { %s19_s8 = sshll.u32 %s567_s7, 4  ;;  %s42_s10 = sshll.u32 %s568_s9, 4  ;;  %s20_s8 = int_to_ptr.vmem [resolvable:$true] %s19_s8  ;;  %s43_s10 = int_to_ptr.vmem [resolvable:$true] %s42_s10 }
  0x15   :  { %s492_s13 = scalar_lea.hbm %s662_s0, 16 }
  0x16   :  { %p493_p8 = scmp.ne.s32.totalorder %s662_s0, %s492_s13  ;;  %p496_p9 = scmp.lt.u32.totalorder %s492_s13, %s662_s0 }
  0x18   :  { %p498_p10 = pnand %p496_p9, %p493_p8 }
  0x1a   :  { %501 = shalt.err (!%p498_p10)
}
  0x1b   :  { %s502_s1 = scalar_lea.vmem %s20_s8, 16  ;;  %s506_s18 = scalar_lea.vmem %s20_s8, 32 }
  0x1c   :  { %p503_p11 = scmp.ne.s32.totalorder %s20_s8, %s502_s1  ;;  %p507_p12 = scmp.lt.s32.totalorder %s20_s8, %s20_s8 }
  0x1d   :  { %p508_p13 = scmp.lt.s32.totalorder %s506_s18, %s502_s1 }
  0x1f   :  { %p509_p0 = por %p508_p13, %p507_p12 }
  0x21   :  { %p510_p1 = pnand %p509_p0, %p503_p11 }
  0x23   :  { %513 = shalt.err (!%p510_p1)
}
  0x24   :  { %22 = dma.hbm_to_vmem [thread:$0]  %s662_s0, 16, %s20_s8, [#allocation3]  }
  0x25   :  { %s514_s23 = scalar_lea.hbm %s665_s3, 8192 }
  0x26   :  { %p515_p2 = scmp.ne.s32.totalorder %s665_s3, %s514_s23  ;;  %p518_p3 = scmp.lt.u32.totalorder %s514_s23, %s665_s3 }
  0x28   :  { %p520_p4 = pnand %p518_p3, %p515_p2 }
  0x2a   :  { %523 = shalt.err (!%p520_p4)
}
  0x2b   :  { %s524_s30 = scalar_lea.vmem %s43_s10, 8192  ;;  %p529_p6 = scmp.lt.s32.totalorder %s43_s10, %s43_s10 }
  0x2c   :  { %p525_p5 = scmp.ne.s32.totalorder %s43_s10, %s524_s30  ;;  %p530_p7 = scmp.lt.s32.totalorder %s524_s30, %s524_s30 }
  0x2e   :  { %p531_p8 = por %p530_p7, %p529_p6 }
  0x30   :  { %p532_p9 = pnand %p531_p8, %p525_p5 }
  0x32   :  { %535 = shalt.err (!%p532_p9)
}
  0x33   :  { %48 = dma.hbm_to_vmem [thread:$0]  %s665_s3, 8192, %s43_s10, [#allocation6], %s565_s28, %s565_s28, %s566_s29  }
  0x34   :  { %558 = dma.done.wait [#allocation3], 16  }
  0x35   :  { %559 = vsyncadd [#allocation3], 4294967280 }
  0x36   :  { %560 = dma.done.wait [#allocation6], 12288  }
  0x37   :  { %561 = vsyncadd [#allocation6], 4294955008  ;;  %v569_v0 = vmov 0.0   ;;  %v62_v1 = vld [vmem:[#allocation5 + $0x8] sm:$0xff]  ;;  %v64_v2 = vld [vmem:[#allocation5 + $0x18] sm:$0xff] }
  0x38   :  { %169 = vmatprep.mubr.f32.mxu0 %v569_v0  ;;  %v61_v3 = vld [vmem:[#allocation5] sm:$0xff]  ;;  %v366_v4 = vpack.c.bf16 %v64_v2, %v62_v1  ;;  %v63_v5 = vld [vmem:[#allocation5 + $0x10] sm:$0xff]  ;;  %v66_v6 = vld [vmem:[#allocation5 + $0x28] sm:$0xff] }
  0x39   :  { %v68_v7 = vld [vmem:[#allocation5 + $0x38] sm:$0xff]  ;;  %v368_v8 = vpack.c.bf16 %v63_v5, %v61_v3  ;;  %v65_v10 = vld [vmem:[#allocation5 + $0x20] sm:$0xff]  ;;  %v67_v11 = vld [vmem:[#allocation5 + $0x30] sm:$0xff] }
  0x3a   :  { %v370_v9 = vpack.c.bf16 %v68_v7, %v66_v6  ;;  %v70_v12 = vld [vmem:[#allocation5 + $0x48] sm:$0xff]  ;;  %367 = vmatprep.subr.bf16.mxu0 %v366_v4  ;;  %v72_v13 = vld [vmem:[#allocation5 + $0x58] sm:$0xff]  ;;  %v372_v14 = vpack.c.bf16 %v67_v11, %v65_v10  ;;  %v69_v16 = vld [vmem:[#allocation5 + $0x40] sm:$0xff] }
  0x3b   :  { %369 = vmatpush1.bf16.msra.mxu0 %v368_v8  ;;  %v374_v15 = vpack.c.bf16 %v72_v13, %v70_v12  ;;  %v71_v17 = vld [vmem:[#allocation5 + $0x50] sm:$0xff]  ;;  %v74_v18 = vld [vmem:[#allocation5 + $0x68] sm:$0xff]  ;;  %v76_v19 = vld [vmem:[#allocation5 + $0x78] sm:$0xff] }
  0x3c   :  { %371 = vmatprep.subr.bf16.mxu0 %v370_v9  ;;  %v376_v20 = vpack.c.bf16 %v71_v17, %v69_v16  ;;  %v378_v21 = vpack.c.bf16 %v76_v19, %v74_v18  ;;  %v73_v22 = vld [vmem:[#allocation5 + $0x60] sm:$0xff]  ;;  %v75_v23 = vld [vmem:[#allocation5 + $0x70] sm:$0xff]  ;;  %v78_v24 = vld [vmem:[#allocation5 + $0x88] sm:$0xff] }
  0x3d   :  { %v80_v25 = vld [vmem:[#allocation5 + $0x98] sm:$0xff]  ;;  %v77_v26 = vld [vmem:[#allocation5 + $0x80] sm:$0xff]  ;;  %v79_v27 = vld [vmem:[#allocation5 + $0x90] sm:$0xff]  ;;  %v380_v31 = vpack.c.bf16 %v75_v23, %v73_v22 }
  0x3e   :  { %v179_v28 = vld [vmem:[#allocation7 + $0x8] sm:$0xff]  ;;  %v181_v29 = vld [vmem:[#allocation7 + $0x18] sm:$0xff]  ;;  %v178_v30 = vld [vmem:[#allocation7] sm:$0xff]  ;;  %v382_v36 = vpack.c.bf16 %v80_v25, %v78_v24  ;;  %v384_v46 = vpack.c.bf16 %v79_v27, %v77_v26 }
  0x3f   :  { %373 = vmatpush1.bf16.msra.mxu0 %v372_v14  ;;  %v398_v32 = vpack.c.bf16 %v181_v29, %v179_v28  ;;  %v180_v33 = vld [vmem:[#allocation7 + $0x10] sm:$0xff]  ;;  %v183_v34 = vld [vmem:[#allocation7 + $0x28] sm:$0xff]  ;;  %v185_v35 = vld [vmem:[#allocation7 + $0x38] sm:$0xff] }
  0x40   :  { %375 = vmatprep.subr.bf16.mxu0 %v374_v15  ;;  %v400_v37 = vpack.c.bf16 %v180_v33, %v178_v30  ;;  %v402_v38 = vpack.c.bf16 %v185_v35, %v183_v34  ;;  %v182_v39 = vld [vmem:[#allocation7 + $0x20] sm:$0xff]  ;;  %v184_v40 = vld [vmem:[#allocation7 + $0x30] sm:$0xff]  ;;  %v187_v41 = vld [vmem:[#allocation7 + $0x48] sm:$0xff] }
  0x41   :  { %v82_v42 = vld [vmem:[#allocation5 + $0xa8] sm:$0xff]  ;;  %v84_v43 = vld [vmem:[#allocation5 + $0xb8] sm:$0xff]  ;;  %399 = vmatprep.subr.bf16.mxu1 %v398_v32  ;;  %v404_v45 = vpack.c.bf16 %v184_v40, %v182_v39  ;;  %v81_v47 = vld [vmem:[#allocation5 + $0xa0] sm:$0xff] }
  0x42   :  { %v189_v44 = vld [vmem:[#allocation7 + $0x58] sm:$0xff]  ;;  %401 = vmatpush1.bf16.msra.mxu1 %v400_v37  ;;  %v186_v49 = vld [vmem:[#allocation7 + $0x40] sm:$0xff]  ;;  %v188_v50 = vld [vmem:[#allocation7 + $0x50] sm:$0xff]  ;;  %v386_v51 = vpack.c.bf16 %v84_v43, %v82_v42 }
  0x43   :  { %377 = vmatpush1.bf16.msra.mxu0 %v376_v20  ;;  %403 = vmatprep.subr.bf16.mxu1 %v402_v38  ;;  %v406_v48 = vpack.c.bf16 %v189_v44, %v187_v41  ;;  %v83_v52 = vld [vmem:[#allocation5 + $0xb0] sm:$0xff]  ;;  %v191_v53 = vld [vmem:[#allocation7 + $0x68] sm:$0xff]  ;;  %v193_v54 = vld [vmem:[#allocation7 + $0x78] sm:$0xff]  ;;  %v408_v57 = vpack.c.bf16 %v188_v50, %v186_v49 }
  0x44   :  { %379 = vmatprep.subr.bf16.mxu0 %v378_v21  ;;  %v86_v55 = vld [vmem:[#allocation5 + $0xc8] sm:$0xff]  ;;  %v88_v56 = vld [vmem:[#allocation5 + $0xd8] sm:$0xff]  ;;  %v388_v58 = vpack.c.bf16 %v83_v52, %v81_v47  ;;  %v85_v59 = vld [vmem:[#allocation5 + $0xc0] sm:$0xff]  ;;  %v410_v60 = vpack.c.bf16 %v193_v54, %v191_v53 }
  0x45   :  { %v190_v61 = vld [vmem:[#allocation7 + $0x60] sm:$0xff]  ;;  %v192_v62 = vld [vmem:[#allocation7 + $0x70] sm:$0xff]  ;;  %v390_v63 = vpack.c.bf16 %v88_v56, %v86_v55  ;;  %v195_v1 = vld [vmem:[#allocation7 + $0x88] sm:$0xff] }
  0x46   :  { %405 = vmatpush1.bf16.msra.mxu1 %v404_v45  ;;  %v87_v0 = vld [vmem:[#allocation5 + $0xd0] sm:$0xff]  ;;  %v197_v2 = vld [vmem:[#allocation7 + $0x98] sm:$0xff]  ;;  %v90_v3 = vld [vmem:[#allocation5 + $0xe8] sm:$0xff]  ;;  %v412_v5 = vpack.c.bf16 %v192_v62, %v190_v61 }
  0x47   :  { %381 = vmatpush1.bf16.msra.mxu0 %v380_v31  ;;  %407 = vmatprep.subr.bf16.mxu1 %v406_v48  ;;  %v92_v4 = vld [vmem:[#allocation5 + $0xf8] sm:$0xff]  ;;  %v392_v6 = vpack.c.bf16 %v87_v0, %v85_v59  ;;  %v89_v7 = vld [vmem:[#allocation5 + $0xe0] sm:$0xff]  ;;  %v414_v8 = vpack.c.bf16 %v197_v2, %v195_v1  ;;  %v196_v10 = vld [vmem:[#allocation7 + $0x90] sm:$0xff] }
  0x48   :  { %383 = vmatprep.subr.bf16.mxu0 %v382_v36  ;;  %v194_v9 = vld [vmem:[#allocation7 + $0x80] sm:$0xff]  ;;  %v394_v11 = vpack.c.bf16 %v92_v4, %v90_v3  ;;  %v91_v12 = vld [vmem:[#allocation5 + $0xf0] sm:$0xff]  ;;  %v199_v13 = vld [vmem:[#allocation7 + $0xa8] sm:$0xff] }
  0x49   :  { %v201_v14 = vld [vmem:[#allocation7 + $0xb8] sm:$0xff]  ;;  %v416_v15 = vpack.c.bf16 %v196_v10, %v194_v9  ;;  %v396_v16 = vpack.c.bf16 %v91_v12, %v89_v7  ;;  %v198_v18 = vld [vmem:[#allocation7 + $0xa0] sm:$0xff]  ;;  %v200_v19 = vld [vmem:[#allocation7 + $0xb0] sm:$0xff] }
  0x4a   :  { %409 = vmatpush1.bf16.msra.mxu1 %v408_v57  ;;  %v418_v17 = vpack.c.bf16 %v201_v14, %v199_v13  ;;  %v203_v20 = vld [vmem:[#allocation7 + $0xc8] sm:$0xff]  ;;  %v205_v21 = vld [vmem:[#allocation7 + $0xd8] sm:$0xff]  ;;  %v420_v22 = vpack.c.bf16 %v200_v19, %v198_v18  ;;  %v202_v25 = vld [vmem:[#allocation7 + $0xc0] sm:$0xff]  ;;  %v95_v18 = vlaneseq }
  0x4b   :  { %385 = vmatpush1.bf16.msra.mxu0 %v384_v46  ;;  %411 = vmatprep.subr.bf16.mxu1 %v410_v60  ;;  %v60_v23 = vld [vmem:[#allocation2] sm:$0x1]  ;;  %v422_v24 = vpack.c.bf16 %v205_v21, %v203_v20  ;;  %v204_v26 = vld [vmem:[#allocation7 + $0xd0] sm:$0xff]  ;;  %v207_v27 = vld [vmem:[#allocation7 + $0xe8] sm:$0xff] }
  0x4c   :  { %387 = vmatprep.subr.bf16.mxu0 %v386_v51  ;;  %v209_v28 = vld [vmem:[#allocation7 + $0xf8] sm:$0xff]  ;;  %v424_v29 = vpack.c.bf16 %v204_v26, %v202_v25  ;;  %v206_v31 = vld [vmem:[#allocation7 + $0xe0] sm:$0xff]  ;;  %v208_v32 = vld [vmem:[#allocation7 + $0xf0] sm:$0xff]  ;;  %v96_v19 = vshrl.u32 %v95_v18, 7  ;;  %vm347_vm0 = vcmp.lt.s32.totalorder %v95_v18, 256 }
  0x4d   :  { %v426_v30 = vpack.c.bf16 %v209_v28, %v207_v27  ;;  %v211_v33 = vld [vmem:[#allocation7 + $0x108] sm:$0xff]  ;;  %v213_v34 = vld [vmem:[#allocation7 + $0x118] sm:$0xff]  ;;  %v428_v35 = vpack.c.bf16 %v208_v32, %v206_v31  ;;  %v210_v37 = vld [vmem:[#allocation7 + $0x100] sm:$0xff]  ;;  %v570_v32 = vmov 1966171168  }
  0x4e   :  { %413 = vmatpush1.bf16.msra.mxu1 %v412_v5  ;;  %v430_v36 = vpack.c.bf16 %v213_v34, %v211_v33  ;;  %v212_v38 = vld [vmem:[#allocation7 + $0x110] sm:$0xff]  ;;  %v215_v39 = vld [vmem:[#allocation7 + $0x128] sm:$0xff]  ;;  %v217_v40 = vld [vmem:[#allocation7 + $0x138] sm:$0xff]  ;;  %v97_v20 = vsub.s32 0, %v96_v19  ;;  %v331_v33 = vunpack.c.l.s4 %v570_v32 }
  0x4f   :  { %389 = vmatpush1.bf16.msra.mxu0 %v388_v58  ;;  %415 = vmatprep.subr.bf16.mxu1 %v414_v8  ;;  %v432_v41 = vpack.c.bf16 %v212_v38, %v210_v37  ;;  %v434_v42 = vpack.c.bf16 %v217_v40, %v215_v39  ;;  %v214_v43 = vld [vmem:[#allocation7 + $0x120] sm:$0xff]  ;;  %v216_v44 = vld [vmem:[#allocation7 + $0x130] sm:$0xff]  ;;  %v219_v45 = vld [vmem:[#allocation7 + $0x148] sm:$0xff] }
  0x50   :  { %391 = vmatprep.subr.bf16.mxu0 %v390_v63  ;;  %v221_v46 = vld [vmem:[#allocation7 + $0x158] sm:$0xff]  ;;  %v436_v47 = vpack.c.bf16 %v216_v44, %v214_v43  ;;  %v218_v49 = vld [vmem:[#allocation7 + $0x140] sm:$0xff]  ;;  %v220_v50 = vld [vmem:[#allocation7 + $0x150] sm:$0xff]  ;;  %v332_v37 = vunpack.c.0.s8 %v331_v33 }
  0x51   :  { %v438_v48 = vpack.c.bf16 %v221_v46, %v219_v45  ;;  %v223_v51 = vld [vmem:[#allocation7 + $0x168] sm:$0xff]  ;;  %v225_v52 = vld [vmem:[#allocation7 + $0x178] sm:$0xff]  ;;  %v440_v53 = vpack.c.bf16 %v220_v50, %v218_v49  ;;  %v222_v55 = vld [vmem:[#allocation7 + $0x160] sm:$0xff] }
  0x52   :  { %417 = vmatpush1.bf16.msra.mxu1 %v416_v15  ;;  %v442_v54 = vpack.c.bf16 %v225_v52, %v223_v51  ;;  %v224_v56 = vld [vmem:[#allocation7 + $0x170] sm:$0xff]  ;;  %v227_v57 = vld [vmem:[#allocation7 + $0x188] sm:$0xff]  ;;  %v229_v58 = vld [vmem:[#allocation7 + $0x198] sm:$0xff]  ;;  %v335_v43 = vsub.s32 %v332_v37, %v96_v19 }
  0x53   :  { %393 = vmatpush1.bf16.msra.mxu0 %v392_v6  ;;  %419 = vmatprep.subr.bf16.mxu1 %v418_v17  ;;  %v444_v59 = vpack.c.bf16 %v224_v56, %v222_v55  ;;  %v446_v60 = vpack.c.bf16 %v229_v58, %v227_v57  ;;  %v226_v61 = vld [vmem:[#allocation7 + $0x180] sm:$0xff]  ;;  %v228_v62 = vld [vmem:[#allocation7 + $0x190] sm:$0xff]  ;;  %v231_v63 = vld [vmem:[#allocation7 + $0x1a8] sm:$0xff] }
  0x54   :  { %395 = vmatprep.subr.bf16.mxu0 %v394_v11  ;;  %v233_v0 = vld [vmem:[#allocation7 + $0x1b8] sm:$0xff]  ;;  %v448_v1 = vpack.c.bf16 %v228_v62, %v226_v61  ;;  %v230_v3 = vld [vmem:[#allocation7 + $0x1a0] sm:$0xff]  ;;  %v232_v4 = vld [vmem:[#allocation7 + $0x1b0] sm:$0xff] }
  0x55   :  { %v450_v2 = vpack.c.bf16 %v233_v0, %v231_v63  ;;  %v235_v5 = vld [vmem:[#allocation7 + $0x1c8] sm:$0xff]  ;;  %v237_v6 = vld [vmem:[#allocation7 + $0x1d8] sm:$0xff]  ;;  %v452_v7 = vpack.c.bf16 %v232_v4, %v230_v3  ;;  %v234_v9 = vld [vmem:[#allocation7 + $0x1c0] sm:$0xff] }
  0x56   :  { %421 = vmatpush1.bf16.msra.mxu1 %v420_v22  ;;  %v454_v8 = vpack.c.bf16 %v237_v6, %v235_v5  ;;  %v236_v10 = vld [vmem:[#allocation7 + $0x1d0] sm:$0xff]  ;;  %v239_v12 = vld [vmem:[#allocation7 + $0x1e8] sm:$0xff]  ;;  %v241_v13 = vld [vmem:[#allocation7 + $0x1f8] sm:$0xff]  ;;  %v101_v22 = vsub.s32 1, %v96_v19 }
  0x57   :  { %397 = vmatpush1.bf16.msra.mxu0 %v396_v16  ;;  %423 = vmatprep.subr.bf16.mxu1 %v422_v24  ;;  %v456_v11 = vpack.c.bf16 %v236_v10, %v234_v9  ;;  %v458_v14 = vpack.c.bf16 %v241_v13, %v239_v12  ;;  %v238_v15 = vld [vmem:[#allocation7 + $0x1e0] sm:$0xff]  ;;  %v240_v16 = vld [vmem:[#allocation7 + $0x1f0] sm:$0xff]  ;;  %v93_v21 = vld [vmem:[%s664_s2] sm:$0x3]  ;;  %s571_s2 = smov [#allocation8]  }
  0x58   :  { %v460_v17 = vpack.c.bf16 %v240_v16, %v238_v15  ;;  %v102_v24 = vrot.slane %v93_v21, %v101_v22  ;;  %v242_v31 = vld [vmem:[%s666_s4] sm:$0x3]  ;;  %s356_s8 = sshll.u32 %s571_s2, 4  ;;  %s357_s8 = int_to_ptr.vmem [resolvable:$true] %s356_s8 }
  0x59   :  { %v247_v34 = vrot.slane %v242_v31, %v97_v20  ;;  %s536_s4 = scalar_lea.vmem %s357_s8, 32  ;;  %p541_p11 = scmp.lt.s32.totalorder %s357_s8, %s357_s8 }
  0x5a   :  { %170 = vmatmul.mubr.f32.vlgmr.msra.gmra.mrb[0].mxu0 %v60_v23  ;;  %425 = vmatpush1.bf16.msra.mxu1 %v424_v29  ;;  %v98_v23 = vrot.slane %v93_v21, %v97_v20  ;;  %p537_p10 = scmp.ne.s32.totalorder %s357_s8, %s536_s4  ;;  %p542_p12 = scmp.lt.s32.totalorder %s536_s4, %s536_s4 }
  0x5b   :  { %427 = vmatprep.subr.bf16.mxu1 %v426_v30 }
  0x5c   :  { %p543_p13 = por %p542_p12, %p541_p11 }
  0x5e   :  { %429 = vmatpush1.bf16.msra.mxu1 %v428_v35  ;;  %v251_v35 = vrot.slane %v242_v31, %v101_v22  ;;  %p544_p0 = pnand %p543_p13, %p537_p10 }
  0x5f   :  { %431 = vmatprep.subr.bf16.mxu1 %v430_v36 }
  0x62   :  { %433 = vmatpush1.bf16.msra.mxu1 %v432_v41 }
  0x63   :  { %435 = vmatprep.subr.bf16.mxu1 %v434_v42 }
  0x66   :  { %437 = vmatpush1.bf16.msra.mxu1 %v436_v47 }
  0x67   :  { %439 = vmatprep.subr.bf16.mxu1 %v438_v48 }
  0x6a   :  { %441 = vmatpush1.bf16.msra.mxu1 %v440_v53 }
  0x6b   :  { %443 = vmatprep.subr.bf16.mxu1 %v442_v54 }
  0x6e   :  { %445 = vmatpush1.bf16.msra.mxu1 %v444_v59 }
  0x6f   :  { %447 = vmatprep.subr.bf16.mxu1 %v446_v60 }
  0x72   :  { %449 = vmatpush1.bf16.msra.mxu1 %v448_v1 }
  0x73   :  { %451 = vmatprep.subr.bf16.mxu1 %v450_v2 }
  0x76   :  { %453 = vmatpush1.bf16.msra.mxu1 %v452_v7 }
  0x77   :  { %455 = vmatprep.subr.bf16.mxu1 %v454_v8 }
  0x7a   :  { %457 = vmatpush1.bf16.msra.mxu1 %v456_v11 }
  0x7b   :  { %459 = vmatprep.subr.bf16.mxu1 %v458_v14 }
  0x7e   :  { %461 = vmatpush1.bf16.msra.mxu1 %v460_v17 }
 0x12d   :  { %v171_v25 = vpop.f32.mrb[0].mxu0 }
 0x12e   :  { %v172_v26 = vadd.f32 %v171_v25, %v98_v23  ;;  %v173_v27 = vpop.f32.mrb[1].mxu0 }
 0x12f   :  { %v174_v28 = vadd.f32 %v173_v27, %v102_v24 }
 0x130   :  { %v176_v30 = vmax.f32 %v172_v26, 0.0 }
 0x131   :  { %v177_v29 = vmax.f32 %v174_v28, 0.0 }
 0x133   :  { %318 = vmatprep.mubr.f32.mxu1 %v177_v29 }
 0x134   :  { %319 = vmatmul.mubr.f32.vlgmr.msra.gmra.mrb[0].mxu1 %v176_v30 }
 0x207   :  { %v320_v36 = vpop.f32.mrb[0].mxu1 }
 0x208   :  { %v321_v38 = vadd.f32 %v320_v36, %v247_v34  ;;  %v322_v39 = vpop.f32.mrb[1].mxu1 }
 0x209   :  { %v323_v40 = vadd.f32 %v322_v39, %v251_v35 }
 0x20a   :  { %v325_v41 = vmax.f32 %v321_v38, 0.0 }
 0x20b   :  { %v326_v42 = vmax.f32 %v323_v40, 0.0 }
 0x20d   :  { %v329_v44 = vcombine.low %v325_v41, %v326_v42 }
 0x20f   :  { %v336_v45 = vrot.slane %v329_v44, %v335_v43 }
 0x211   :  { %v343_v46 = vrot.slane %v336_v45, %v335_v43 }
 0x213   :  { %349 = vst.msk [vmem:[#allocation8] sm:$0x3] %vm347_vm0, %v343_v46 }
 0x214   :  { %547 = shalt.err (!%p544_p0)
}
 0x215   :  { %s548_s11 = scalar_lea.hbm %s667_s5, 32 }
 0x216   :  { %p549_p1 = scmp.ne.s32.totalorder %s667_s5, %s548_s11  ;;  %p552_p2 = scmp.lt.u32.totalorder %s548_s11, %s667_s5 }
 0x218   :  { %p554_p3 = pnand %p552_p2, %p549_p1 }
 0x21a   :  { %557 = shalt.err (!%p554_p3)
}
 0x21b   :  { %359 = dma.vmem_to_hbm [thread:$0]  %s357_s8, 32, %s667_s5, [#allocation4]  }
 0x21c   :  { %562 = dma.done.wait [#allocation4], 32  }
 0x21d   :  { %563 = vsyncadd [#allocation4], 4294967264 }
 0x21e   :  { %363 = vsyncpa [#allocation3], 1 }
 0x21f   :  { %364 = vsyncpa [#allocation6], 1 }
 0x220   :  { %365 = vsyncpa [#allocation4], 1 }

</bundles_post_ra>
